<compile_context>
chip_gen: v7x
topology: tpu7x:2x2x1
jax: 0.10.0
libtpu: 0.0.40
codegen_flags: <defaults>
</compile_context>

<pallas_src>
import jax
import jax.numpy as jnp
from jax.experimental import pallas as pl
from jax.experimental.pallas import tpu as pltpu


def _round_down(n, m):
    return n // m * m


def _vmem_capacity_bytes():
    """Physical VMEM per TensorCore, with a conservative fallback (v7x = 64 MiB)."""
    try:
        cap = getattr(pltpu.get_tpu_info(), "vmem_capacity_bytes", None)
        if cap:
            return int(cap)
    except Exception:
        pass
    return 64 << 20


def _unroll_for(n_iters):
    return True if n_iters <= 8 else 4


# --------------------------------------------------------------------------- #
# Chunked in-VMEM sweeps (bounded live vregs / spill scratch).
# --------------------------------------------------------------------------- #
def _masked_sums(x_ref, len_b, row0, chunk_t, n_full, tail_t):
    """sum(x) and sum(x*x) over the (rows, D) ref view, where a row is valid iff
    (row0 + row) < len_b.  Streams the view in chunk_t-row chunks (chunk_t % 8 == 0)."""

    def one(start, size):
        x = x_ref[pl.ds(start, size), :].astype(jnp.float32)
        row = jax.lax.broadcasted_iota(jnp.int32, (size, 1), 0) + (row0 + start)
        xm = jnp.where(row < len_b, x, jnp.float32(0.0))       # one vsel / element
        return jnp.sum(xm), jnp.sum(xm * xm)

    s1 = jnp.float32(0.0)
    s2 = jnp.float32(0.0)
    if n_full > 0:
        def body(c, carry):
            a1, a2 = carry
            d1, d2 = one(pl.multiple_of(c * chunk_t, 8), chunk_t)
            return a1 + d1, a2 + d2
        s1, s2 = jax.lax.fori_loop(0, n_full, body, (s1, s2),
                                   unroll=_unroll_for(n_full))
    if tail_t > 0:
        d1, d2 = one(n_full * chunk_t, tail_t)
        s1, s2 = s1 + d1, s2 + d2
    return s1, s2


def _normalize(x_ref, o_ref, mean, inv, chunk_t, n_full, tail_t):
    """o = (x - mean) * inv over the whole (rows, D) view (valid AND padded rows,
    matching the PyTorch forward), streamed in chunks."""

    def one(start, size):
        x = x_ref[pl.ds(start, size), :].astype(jnp.float32)
        o_ref[pl.ds(start, size), :] = ((x - mean) * inv).astype(o_ref.dtype)

    if n_full > 0:
        def body(c, carry):
            one(pl.multiple_of(c * chunk_t, 8), chunk_t)
            return carry
        jax.lax.fori_loop(0, n_full, body, jnp.int32(0), unroll=_unroll_for(n_full))
    if tail_t > 0:
        one(n_full * chunk_t, tail_t)


# --------------------------------------------------------------------------- #
# One-shot kernel: whole (T, D) block of one batch element per grid step.
# --------------------------------------------------------------------------- #
def _oneshot_kernel(eps, d_model, chunk_t, n_full, tail_t):
    def kernel(len_ref, x_ref, o_ref):
        len_b = len_ref[pl.program_id(0)]
        s1, s2 = _masked_sums(x_ref, len_b, 0, chunk_t, n_full, tail_t)
        denom = jnp.maximum(len_b.astype(jnp.float32) * jnp.float32(d_model), 1.0)
        mean = s1 / denom
        var = jnp.maximum(s2 / denom - mean * mean, 0.0)
        inv = jax.lax.rsqrt(var + jnp.float32(eps))             # EUP rsqrt
        _normalize(x_ref, o_ref, mean, inv, chunk_t, n_full, tail_t)
    return kernel


# --------------------------------------------------------------------------- #
# Tiled fallback, fused single call: grid (B, 2 phases, n_tiles).
#   phase 0: accumulate s1/s2 into (1,1) VMEM scratch; at the last tile turn them
#            into (mean, 1/sqrt(var+eps)).
#   phase 1: normalize each tile from the scalar stats and write it out.
# --------------------------------------------------------------------------- #
def _tiled_kernel(eps, d_model, tile_t, chunk_t, n_full, tail_t):
    def kernel(len_ref, x_ref, o_ref, s1_ref, s2_ref):
        b = pl.program_id(0)
        phase = pl.program_id(1)
        t = pl.program_id(2)
        len_b = len_ref[b]

        @pl.when((phase == 0) & (t == 0))
        def _():
            s1_ref[...] = jnp.zeros_like(s1_ref)
            s2_ref[...] = jnp.zeros_like(s2_ref)

        @pl.when(phase == 0)
        def _():
            d1, d2 = _masked_sums(x_ref, len_b, t * tile_t, chunk_t, n_full, tail_t)
            s1_ref[...] += d1
            s2_ref[...] += d2

            @pl.when(t == pl.num_programs(2) - 1)
            def _():
                denom = jnp.maximum(
                    len_b.astype(jnp.float32) * jnp.float32(d_model), 1.0)
                mean = s1_ref[...] / denom
                var = jnp.maximum(s2_ref[...] / denom - mean * mean, 0.0)
                s1_ref[...] = mean
                s2_ref[...] = jax.lax.rsqrt(var + jnp.float32(eps))

        @pl.when(phase == 1)
        def _():
            _normalize(x_ref, o_ref, s1_ref[...], s2_ref[...],
                       chunk_t, n_full, tail_t)
    return kernel


# --------------------------------------------------------------------------- #
# Wrapper
# --------------------------------------------------------------------------- #
def masked_layer_norm(x, mask, input_len, eps=1e-5, *,
                      tile_t=None, chunk_elems=1 << 16):
    """Masked LayerNorm over (time, dModel), matching MaskedLayerNorm.forward.

    x: (B, T, D).  mask: (B, T) bool, True = padded (accepted for API parity; the
    kernels rebuild the standard trailing-padding mask from `input_len`, which is how
    SetMaskandLength defines it).  input_len: (B,) valid lengths.
    """
    # TODO(synk): validate `mask == (arange(T) >= input_len)` in debug builds; a
    # non-trailing mask would silently disagree with the length-derived mask.
    del mask
    B, T, D = x.shape
    itemsize = jnp.dtype(x.dtype).itemsize
    lens = input_len.astype(jnp.int32)

    vmem_cap = _vmem_capacity_bytes()
    io_vmem = 4 * T * D * itemsize                  # in + out, double-buffered
    oneshot_budget = int(vmem_cap * 0.62)           # ~40 MiB v7x, ~80 MiB v5e/v6e

    # Row-chunk size for the in-kernel streaming sweeps (~chunk_elems f32 live).
    chunk_t = max(8, _round_down(max(chunk_elems // D, 8), 8))

    if tile_t is None and io_vmem <= oneshot_budget:
        # ---- one-shot path --------------------------------------------------- #
        n_full, tail_t = T // chunk_t, T % chunk_t
        vmem_limit = (int(min(vmem_cap - (4 << 20), io_vmem + (8 << 20)))
                      if io_vmem > (8 << 20) else None)
        # TODO(synk): for B == 1 on v7x, split T across the two TensorCores with a
        # cross-core s1/s2 combine so the second core is not idle.
        return pl.pallas_call(
            _oneshot_kernel(eps, D, chunk_t, n_full, tail_t),
            out_shape=jax.ShapeDtypeStruct((B, T, D), x.dtype),
            grid_spec=pltpu.PrefetchScalarGridSpec(
                num_scalar_prefetch=1,
                grid=(B,),
                in_specs=[pl.BlockSpec((None, T, D), lambda b, ln: (b, 0, 0))],
                out_specs=pl.BlockSpec((None, T, D), lambda b, ln: (b, 0, 0)),
            ),
            compiler_params=pltpu.CompilerParams(
                dimension_semantics=("parallel",),
                vmem_limit_bytes=vmem_limit),
        )(lens, x)

    # ---- tiled fused fallback: bounded VMEM for very long sequences ---------- #
    if tile_t is None:
        tile_t = max(8, _round_down((2 << 20) // (D * itemsize), 8))   # ~2 MiB tiles
    tile_t = min(tile_t, T)
    if tile_t < T:
        tile_t = max(8, _round_down(tile_t, 8))      # block dim must be 8-aligned
    n_tiles = pl.cdiv(T, tile_t)
    n_full, tail_t = tile_t // chunk_t, tile_t % chunk_t

    return pl.pallas_call(
        _tiled_kernel(eps, D, tile_t, chunk_t, n_full, tail_t),
        out_shape=jax.ShapeDtypeStruct((B, T, D), x.dtype),
        grid_spec=pltpu.PrefetchScalarGridSpec(
            num_scalar_prefetch=1,
            grid=(B, 2, n_tiles),
            in_specs=[pl.BlockSpec((None, tile_t, D),
                                   lambda b, p, t, ln: (b, t, 0))],
            # phase 0 pins the output block index, so each output tile is DMA'd to
            # HBM exactly once, with the data written during phase 1.
            out_specs=pl.BlockSpec((None, tile_t, D),
                                   lambda b, p, t, ln: (b, p * t, 0)),
            scratch_shapes=[pltpu.VMEM((1, 1), jnp.float32),
                            pltpu.VMEM((1, 1), jnp.float32)],
        ),
        compiler_params=pltpu.CompilerParams(
            dimension_semantics=("parallel", "arbitrary", "arbitrary"),
            vmem_limit_bytes=int(min(vmem_cap - (4 << 20), 32 << 20))),
    )(lens, x)


def masked_layer_norm_ref(x, mask, input_len, eps=1e-5):
    """Pure-JAX reference mirroring the PyTorch forward exactly."""
    d_model = x.shape[-1]
    valid = (~mask)[:, :, None].astype(x.dtype)
    denom = input_len.astype(x.dtype) * d_model
    mean = (x * valid).sum(axis=(1, 2)) / denom
    mean_e = mean[:, None, None]
    var = (((x - mean_e) ** 2) * valid).sum(axis=(1, 2)) / denom
    return (x - mean_e) / jnp.sqrt(var[:, None, None] + eps)


if __name__ == "__main__":
    key = jax.random.PRNGKey(0)
    k1, k2, k3, k4 = jax.random.split(key, 4)

    def run_case(k, B, T, D, lens, **kw):
        x = jax.random.normal(k, (B, T, D), dtype=jnp.float32)
        input_len = jnp.array(lens, dtype=jnp.int32)
        mask = jnp.arange(T)[None, :] >= input_len[:, None]        # True = padded
        out = jax.block_until_ready(
            masked_layer_norm(x, mask, input_len, eps=1e-5, **kw))
        ref = masked_layer_norm_ref(x, mask, input_len, eps=1e-5)
        assert out.shape == ref.shape
        assert jnp.allclose(out, ref, atol=1e-4, rtol=1e-4), \
            f"mismatch B={B} T={T} D={D} kw={kw}"

    # one-shot path, D not a multiple of 128
    run_case(k1, 2, 8, 32, [8, 5])
    # one-shot path, multi-chunk in-kernel streaming loops + ragged tail chunk
    run_case(k2, 2, 36, 32, [33, 17], chunk_elems=256)
    # tiled fused path (2 phases x 2 tiles), lane-aligned D
    run_case(k3, 2, 16, 128, [16, 9], tile_t=8)
    # tiled fused path with a partial edge tile and D not a multiple of 128
    run_case(k4, 2, 20, 48, [20, 13], tile_t=8)

    print("KERNEL_OK")
</pallas_src>

<mosaic_0001>
module attributes {stable_mosaic.version = 11 : i64} {
  func.func @kernel(%arg0: i32, %arg1: memref<2xi32, #tpu.memory_space<smem>>, %arg2: memref<1x8x32xf32, #tpu.memory_space<vmem>>, %arg3: memref<1x8x32xf32, #tpu.memory_space<vmem>>) attributes {dimension_semantics = [#tpu.dimension_semantics<parallel>], iteration_bounds = array<i64: 2>, scalar_prefetch = 1 : i64, scratch_operands = 0 : i64, tpu.core_type = #tpu.core_type<tc>, window_params = [{transform_indices = @transform_0, window_bounds = array<i64: 1, 8, 32>}, {transform_indices = @transform_1, window_bounds = array<i64: 1, 8, 32>}]} {
    %0 = arith.index_cast %arg0 : i32 to index
    %1 = memref.load %arg1[%0] : memref<2xi32, #tpu.memory_space<smem>>
    %c0 = arith.constant 0 : index
    %c0_0 = arith.constant 0 : index
    %c0_1 = arith.constant 0 : index
    %2 = vector.load %arg2[%c0, %c0_0, %c0_1] : memref<1x8x32xf32, #tpu.memory_space<vmem>>, vector<1x8x32xf32>
    %3 = vector.shape_cast %2 : vector<1x8x32xf32> to vector<8x32xf32>
    %4 = tpu.iota {dimensions = array<i32: 0>} : vector<8x1xi32>
    %c0_i32 = arith.constant 0 : i32
    %5 = vector.broadcast %c0_i32 : i32 to vector<8x1xi32>
    %6 = arith.addi %4, %5 : vector<8x1xi32>
    %7 = vector.broadcast %1 : i32 to vector<8x1xi32>
    %8 = arith.cmpi slt, %6, %7 : vector<8x1xi32>
    %cst = arith.constant 0.000000e+00 : f32
    %9 = vector.shape_cast %8 : vector<8x1xi1> to vector<8x1xi1>
    %10 = vector.broadcast %9 : vector<8x1xi1> to vector<8x32xi1>
    %11 = vector.broadcast %cst : f32 to vector<8x32xf32>
    %12 = arith.select %10, %3, %11 : vector<8x32xi1>, vector<8x32xf32>
    %13 = vector.shape_cast %12 : vector<8x32xf32> to vector<1x8x32xf32>
    %cst_2 = arith.constant dense<0.000000e+00> : vector<1xf32>
    %14 = vector.multi_reduction <add>, %13, %cst_2 [1, 2] : vector<1x8x32xf32> to vector<1xf32>
    %15 = vector.shape_cast %14 : vector<1xf32> to vector<1x1x1xf32>
    %16 = vector.extract %15[0, 0, 0] : f32 from vector<1x1x1xf32>
    %17 = arith.mulf %12, %12 : vector<8x32xf32>
    %18 = vector.shape_cast %17 : vector<8x32xf32> to vector<1x8x32xf32>
    %cst_3 = arith.constant dense<0.000000e+00> : vector<1xf32>
    %19 = vector.multi_reduction <add>, %18, %cst_3 [1, 2] : vector<1x8x32xf32> to vector<1xf32>
    %20 = vector.shape_cast %19 : vector<1xf32> to vector<1x1x1xf32>
    %21 = vector.extract %20[0, 0, 0] : f32 from vector<1x1x1xf32>
    %cst_4 = arith.constant 0.000000e+00 : f32
    %22 = arith.addf %cst_4, %16 : f32
    %cst_5 = arith.constant 0.000000e+00 : f32
    %23 = arith.addf %cst_5, %21 : f32
    %24 = arith.sitofp %1 : i32 to f32
    %cst_6 = arith.constant 3.200000e+01 : f32
    %25 = arith.mulf %24, %cst_6 : f32
    %cst_7 = arith.constant 1.000000e+00 : f32
    %26 = arith.maximumf %25, %cst_7 : f32
    %27 = arith.divf %22, %26 : f32
    %28 = arith.divf %23, %26 : f32
    %29 = arith.mulf %27, %27 : f32
    %30 = arith.subf %28, %29 : f32
    %cst_8 = arith.constant 0.000000e+00 : f32
    %31 = arith.maximumf %30, %cst_8 : f32
    %cst_9 = arith.constant 9.99999974E-6 : f32
    %32 = arith.addf %31, %cst_9 : f32
    %33 = math.rsqrt %32 : f32
    %c0_10 = arith.constant 0 : index
    %c0_11 = arith.constant 0 : index
    %c0_12 = arith.constant 0 : index
    %34 = vector.load %arg2[%c0_10, %c0_11, %c0_12] : memref<1x8x32xf32, #tpu.memory_space<vmem>>, vector<1x8x32xf32>
    %35 = vector.shape_cast %34 : vector<1x8x32xf32> to vector<8x32xf32>
    %36 = vector.broadcast %27 : f32 to vector<8x32xf32>
    %37 = arith.subf %35, %36 : vector<8x32xf32>
    %38 = vector.broadcast %33 : f32 to vector<8x32xf32>
    %39 = arith.mulf %37, %38 : vector<8x32xf32>
    %c0_13 = arith.constant 0 : index
    %c0_14 = arith.constant 0 : index
    %c0_15 = arith.constant 0 : index
    %40 = vector.load %arg3[%c0_13, %c0_14, %c0_15] : memref<1x8x32xf32, #tpu.memory_space<vmem>>, vector<1x8x32xf32>
    %41 = vector.shape_cast %40 : vector<1x8x32xf32> to vector<8x32xf32>
    %42 = vector.shape_cast %39 : vector<8x32xf32> to vector<1x8x32xf32>
    tpu.vector_store %arg3[%c0_13, %c0_14, %c0_15], %42 {strides = array<i32>} : memref<1x8x32xf32, #tpu.memory_space<vmem>>, vector<1x8x32xf32>,
    return
  }
  func.func @transform_0(%arg0: i32, %arg1: memref<2xi32, #tpu.memory_space<smem>>) -> (i32, i32, i32) {
    %c0_i32 = arith.constant 0 : i32
    %c0_i32_0 = arith.constant 0 : i32
    %c0_i32_1 = arith.constant 0 : i32
    return %arg0, %c0_i32, %c0_i32_0 : i32, i32, i32
  }
  func.func @transform_1(%arg0: i32, %arg1: memref<2xi32, #tpu.memory_space<smem>>) -> (i32, i32, i32) {
    %c0_i32 = arith.constant 0 : i32
    %c0_i32_0 = arith.constant 0 : i32
    %c0_i32_1 = arith.constant 0 : i32
    return %arg0, %c0_i32, %c0_i32_0 : i32, i32, i32
  }
}

</mosaic_0001>

<bundles_post_ra>
// kernel: tpu_custom_call.1
= control target key start
LH: loop header
LB: loop body
LE: loop exit
PB: predicated region body
PF: predicated region fallthrough
CT: control target
= control target key end

     0   :  { %s661_s0 = inlined_call_operand.hbm [shape: s32[2], index: 0, kind: input, shape index: {}]   ;;  %s662_s1 = inlined_call_operand.hbm [shape: f32[2,8,32], index: 1, kind: input, shape index: {}]   ;;  %s663_s2 = inlined_call_operand.hbm [shape: f32[2,8,32], index: 2, kind: output, shape index: {}]  }
   0x1   :  { %s350_s11 = scalar_lea.hbm %s661_s0, 16 }
   0x2   :  { %p351_p0 = scmp.ne.s32.totalorder %s661_s0, %s350_s11  ;;  %p354_p1 = scmp.lt.u32.totalorder %s350_s11, %s661_s0 }
   0x4   :  { %p356_p2 = pnand %p354_p1, %p351_p0 }
   0x6   :  { %359 = shalt.err (!%p356_p2)  }
   0x7   :  { %s460_s16 = smov [#allocation3]  }
   0x8   :  { %8 = dma.hbm_to_smem %s661_s0, 16, %s460_s16, [#allocation2] }
   0x9   :  { %434 = dma.done.wait [#allocation2], 16 }
   0xa   :  { %435 = vsyncadd [#allocation2], 4294967280 }
   0xb   :  { %10 = sfence }
   0xc   :  { %11 = vsyncpa [#allocation5], 0 }
   0xd   :  { %13 = vsyncpa [#allocation5 + $0x1], 0 }
   0xe   :  { %14 = vsyncpa [#allocation6], 0 }
   0xf   :  { %16 = vsyncpa [#allocation6 + $0x1], 0  ;;  %s492_s19 = smov 0   ;;  %s494_s20 = smov 0  }
  0x10   :  { %s496_s21 = smov 0   ;;  %s498_s22 = smov 0  }
  0x11 LB: > { %s513_s0 = sadd.s32 4294967295, %s458_s22   ;;  %s277_s23 = sadd.s32 4294967294, %s458_s22   ;;  %s458_s22 = sphi %s498_s22, %s678_s22   ;;  %s454_s21 = sphi %s496_s21, %s677_s21   ;;  %s450_s20 = sphi %s494_s20, %s676_s20   ;;  %s446_s19 = sphi %s492_s19, %s675_s19  }
  0x12   : > { %s517_s24 = sadd.s32 1, %s458_s22   ;;  %s29_s25 = sadd.s32 1, %s454_s21 }
  0x13   : > { %s26_s26 = ssub.s32 %s458_s22, %s517_s24  ;;  %p36_p3 = scmp.ne.s32.totalorder %s454_s21, %s450_s20 }
  0x14   : > { %p27_p4 = scmp.eq.s32.totalorder %s26_s26, 0  ;;  %p37_p5 = scmp.eq.s32.totalorder %s458_s22, 0 }
  0x15   : > { %p42_p6 = scmp.ne.s32.totalorder %s450_s20, %s446_s19  ;;  %p43_p7 = scmp.eq.s32.totalorder %s513_s0, 0 }
  0x16   : > { %s529_s27 = scalar_select %p27_p4, %s454_s21, %s29_s25  }
  0x17   : > { %p531_p8 = por %p37_p5, %p36_p3  ;;  %p535_p9 = por %p43_p7, %p42_p6 }
  0x18   : > { %p66_p10 = scmp.eq.s32.totalorder %s513_s0, 1  ;;  %p72_p11 = scmp.eq.s32.totalorder %s277_s23, 1 }
  0x19   : > { %p309_p13 = scmp.lt.s32.totalorder %s458_s22, 2  ;;  %s92_s4 = sand.u32 1, %s454_s21  }
  0x1a   : > { %p542_p0 = por %p66_p10, %p36_p3  ;;  %p546_p1 = por %p72_p11, %p42_p6 }
  0x1b   : > { %s281_s5 = sshll.u32 %s458_s22, 7  ;;  %s280_s6 = sshll.u32 %s92_s4, 3 }
  0x1c   : > { %s667_s30 = scalar_select %p542_p0, 1, 0 }
  0x1d   : > { %s668_s3 = scalar_select %p546_p1, 1, 0 }
  0x1e   : > { %s555_s9 = scalar_lea.hbm %s662_s1, %s281_s5  ;;  %s96_s10 = scalar_lea.vmem [#allocation4], %s280_s6 }
  0x1f   : > { %s103_s11 = sshll.u32 %s96_s10, 4  ;;  %p559_p2 = pnand %p309_p13, %p531_p8  ;;  %s563_s11 = int_to_ptr.vmem [resolvable:$true] %s103_s11 }
  0x20   : > { %s93_s13 = scalar_lea.sflag [#allocation5], %s92_s4  ;;  %s360_s14 = scalar_lea.hbm %s555_s9, 128 }
  0x21   : > { %p361_p5 = scmp.ne.s32.totalorder %s555_s9, %s360_s14  ;;  %p362_p6 = pneg %p559_p2 }
  0x22   : > { %s365_s17 = scalar_lea.hbm %s662_s1, 256  ;;  %p366_p8 = scmp.lt.u32.totalorder %s555_s9, %s662_s1 }
  0x23   : > { %p363_p7 = pnand %p362_p6, %p361_p5  ;;  %p367_p11 = scmp.lt.u32.totalorder %s365_s17, %s360_s14 }
  0x24   : > { %p369_p12 = scmp.lt.u32.totalorder %s360_s14, %s555_s9 }
  0x25   : > { %p364_p10 = pneg %p363_p7  ;;  %p368_p13 = por %p367_p11, %p366_p8 }
  0x27   : > { %p370_p3 = por %p369_p12, %p368_p13 }
  0x29   : > { %p371_p4 = pnand %p370_p3, %p364_p10 }
  0x2b   : > { %374 = shalt.err (!%p371_p4)
}
  0x2c   : > { %s375_s25 = scalar_lea.vmem %s563_s11, 128  ;;  %s461_s26 = smov [#allocation4]  }
  0x2d   : > { %p376_p5 = scmp.ne.s32.totalorder %s563_s11, %s375_s25  ;;  %s380_s28 = sshll.u32 %s461_s26, 4  ;;  %s381_s28 = int_to_ptr.vmem [resolvable:$false] %s380_s28 }
  0x2e   : > { %s382_s4 = scalar_lea.vmem %s381_s28, 256  ;;  %p383_p0 = scmp.lt.s32.totalorder %s563_s11, %s381_s28 }
  0x2f   : > { %p378_p7 = pnand %p376_p5, %p362_p6  ;;  %p384_p8 = scmp.lt.s32.totalorder %s382_s4, %s375_s25 }
  0x31   : > { %p379_p1 = pneg %p378_p7  ;;  %p385_p11 = por %p384_p8, %p383_p0 }
  0x33   : > { %p386_p12 = pnand %p385_p11, %p379_p1 }
  0x35   : > { %389 = shalt.err (!%p386_p12)
}
  0x36   : > { %304 = dma.hbm_to_vmem [thread:$0]  (!%p559_p2), %s555_s9, 128, %s563_s11, %s93_s13  }
  0x37   : > { %p670_p3 = scmp.lt.s32.totalorder %s458_s22, 3  ;;  %p671_p4 = scmp.ge.s32.totalorder %s458_s22, 1 }
  0x39   : > { %p109_p6 = pnand %p671_p4, %p670_p3 }
  0x3a   : > { %s597_s5 = sand.u32 (!%p109_p6), 1, %s450_s20  }
  0x3b   : > { %112 = sbr.rel (%p109_p6) target bundleno = 374 (0x176), region = 24  ;;  %s283_s6 = sshll.u32 (!%p109_p6), %s597_s5, 3 }
  0x3c   : > { %s115_s7 = scalar_lea.sflag (!%p109_p6), [#allocation5], %s597_s5  ;;  %s118_s8 = scalar_lea.vmem (!%p109_p6), [#allocation4], %s283_s6 }
  0x42   : > { %437 = dma.done.wait (%p535_p9), %s115_s7, 128  }
  0x43   : > { %439 = vsyncadd (%p535_p9), %s115_s7, 4294967168  ;;  %v139_v0 = vlaneseq  ;;  %s137_s9 = sld [smem:[#allocation3 + %s513_s0]]  ;;  %v138_v2 = vld [vmem:[%s118_s8] sm:$0xff]  ;;  %vm146_vm0 = vcmask 261120   ;;  %s462_s29 = smov 1.0  }
  0x44   : > { %s463_s25 = smov 0.0   ;;  %s286_s4 = sshll.u32 %s513_s0, 7 }
  0x45   : > { %v140_v1 = vshrl.u32 %v139_v0, 7  ;;  %s136_s7 = scalar_lea.vmem [#allocation7], %s283_s6  ;;  %s194_s0 = scalar_lea.sflag [#allocation6], %s597_s5 }
  0x46   : > { %s207_s8 = sshll.u32 %s136_s7, 4  ;;  %p672_p0 = scmp.ne.s32.totalorder %s667_s30, 0  ;;  %s618_s8 = int_to_ptr.vmem [resolvable:$true] %s207_s8 }
  0x47   : > { %s464_s6 = smov [#allocation7]  }
  0x49   : > { %v141_v3 = vstv %s137_s9  ;;  %s170_s10 = scvt.s32.f32 %s137_s9 }
  0x4a   : > { %vm142_vm1 = vcmp.lt.s32.totalorder %v140_v1, %v141_v3 }
  0x4b   : > { %v145_v4 = vsel %vm142_vm1, %v138_v2, 0.0  ;;  %s171_s11 = smul.f32 32.0, %s170_s10 }
  0x4c   : > { %v147_v5 = vsel %vm146_vm0, %v145_v4, 0.0  ;;  %v157_v6 = vmul.f32 %v145_v4, %v145_v4 }
  0x4d   : > { %148 = vadd.xlane.f32.xlu0 %v147_v5  ;;  %s172_s12 = smax.f32 %s462_s29, %s171_s11  ;;  %s616_s29 = scalar_lea.hbm %s663_s2, %s286_s4 }
  0x4e   : > { %v158_v7 = vsel %vm146_vm0, %v157_v6, 0.0  ;;  %v173_v10 = vstv %s172_s12  ;;  %s390_s12 = scalar_lea.vmem %s618_s8, 128 }
  0x4f   : > { %346 = vrcp.f32 %v173_v10  ;;  %p391_p9 = scmp.ne.s32.totalorder %s618_s8, %s390_s12 }
  0x51   : > { %159 = vadd.xlane.f32.xlu0 %v158_v7  ;;  %p392_p1 = pnand %p391_p9, %p672_p0 }
  0x53   : > { %p393_p2 = pneg %p392_p1 }
  0x59   : > { %v347_v22 = vpop.eup %346 }
  0xda   : > { %v149_v8 = vpop.xlane.xlu0 %148 }
  0xdb   : > { %v150_v9 = vrot.slane %v149_v8, 4 }
  0xdd   : > { %v151_v11 = vadd.f32 %v150_v9, %v149_v8 }
  0xde   : > { %v160_v12 = vpop.xlane.xlu0 %159 }
  0xdf   : > { %v152_v13 = vrot.slane %v151_v11, 2  ;;  %v161_v14 = vrot.slane %v160_v12, 4 }
  0xe1   : > { %v162_v15 = vadd.f32 %v161_v14, %v160_v12  ;;  %v153_v16 = vadd.f32 %v152_v13, %v151_v11 }
  0xe3   : > { %v163_v17 = vrot.slane %v162_v15, 2  ;;  %v154_v18 = vrot.slane %v153_v16, 1 }
  0xe5   : > { %v164_v19 = vadd.f32 %v163_v17, %v162_v15  ;;  %v155_v20 = vadd.f32 %v154_v18, %v153_v16 }
  0xe7   : > { %289 = vpush %v155_v20  ;;  %v165_v21 = vrot.slane %v164_v19, 1 }
  0xe9   : > { %v166_v23 = vadd.f32 %v165_v21, %v164_v19 }
  0xeb   : > { %291 = vpush %v166_v23 }
  0xec   : > { %293 = vpush %v347_v22 }
 0x118   : > { %s290_s13 = spop %289 }
 0x11c   : > { %s292_s14 = spop %291 }
 0x11d   : > { %s294_s15 = spop %293 }
 0x11e   : > { %s176_s16 = smul.f32 %s294_s15, %s290_s13  ;;  %s394_s13 = sshll.u32 %s464_s6, 4  ;;  %s395_s13 = int_to_ptr.vmem [resolvable:$false] %s394_s13 }
 0x11f   : > { %s180_s17 = smul.f32 %s294_s15, %s292_s14  ;;  %s396_s14 = scalar_lea.vmem %s395_s13, 256 }
 0x120   : > { %s181_s18 = smul.f32 %s176_s16, %s176_s16  ;;  %v188_v26 = vstv %s176_s16  ;;  %p397_p10 = scmp.lt.s32.totalorder %s618_s8, %s395_s13 }
 0x121   : > { %v189_v27 = vsub.f32 %v138_v2, %v188_v26  ;;  %p398_p13 = scmp.lt.s32.totalorder %s396_s14, %s390_s12 }
 0x122   : > { %s182_s23 = ssub.f32 %s180_s17, %s181_s18 }
 0x123   : > { %p399_p5 = por %p398_p13, %p397_p10 }
 0x124   : > { %s183_s26 = smax.f32 %s463_s25, %s182_s23 }
 0x125   : > { %s184_s28 = sadd.f32 1e-05, %s183_s26  ;;  %p400_p7 = pnand %p399_p5, %p393_p2 }
 0x127   : > { %v185_v24 = vstv %s184_s28 }
 0x128   : > { %348 = vrsqrt.f32 %v185_v24 }
 0x132   : > { %v349_v25 = vpop.eup %348 }
 0x133   : > { %295 = vpush %v349_v25 }
 0x164   : > { %s296_s9 = spop %295 }
 0x165   : > { %v190_v28 = vstv %s296_s9 }
 0x166   : > { %v191_v29 = vmul.f32 %v190_v28, %v189_v27 }
 0x168   : > { %192 = vst.msk [vmem:[%s136_s7] sm:$0xff] %vm146_vm0, %v191_v29 }
 0x169   : > { %403 = shalt.err (!%p400_p7)
}
 0x16a   : > { %s404_s5 = scalar_lea.hbm %s616_s29, 128  ;;  %s408_s17 = scalar_lea.hbm %s663_s2, 256 }
 0x16b   : > { %p405_p8 = scmp.ne.s32.totalorder %s616_s29, %s404_s5  ;;  %p409_p3 = scmp.lt.u32.totalorder %s616_s29, %s663_s2 }
 0x16c   : > { %p410_p4 = scmp.lt.u32.totalorder %s408_s17, %s404_s5  ;;  %p412_p9 = scmp.lt.u32.totalorder %s404_s5, %s616_s29 }
 0x16d   : > { %p406_p11 = pnand %p405_p8, %p672_p0 }
 0x16e   : > { %p411_p6 = por %p410_p4, %p409_p3 }
 0x16f   : > { %p407_p12 = pneg %p406_p11 }
 0x170   : > { %p413_p1 = por %p412_p9, %p411_p6 }
 0x172   : > { %p414_p2 = pnand %p413_p1, %p407_p12 }
 0x174   : > { %417 = shalt.err (!%p414_p2)
}
 0x175   : > { %299 = dma.vmem_to_hbm [thread:$0]  (%p672_p0), %s618_s8, 128, %s616_s29, %s194_s0  }
 0x176 PF: > { %s219_s25 = sand.u32 1, %s446_s19   ;;  %p673_p10 = scmp.ne.s32.totalorder %s668_s3, 0 }
 0x177   : > { %p674_p13 = scmp.ge.s32.totalorder %s458_s22, 2  ;;  %s220_s26 = scalar_lea.sflag [#allocation6], %s219_s25 }
 0x179   : > { %p306_p5 = pnand %p674_p13, %p673_p10 }
 0x17b   : > { %441 = dma.done.wait (!%p306_p5), %s220_s26, 128  }
 0x17c   : > { %443 = vsyncadd (!%p306_p5), %s220_s26, 4294967168  ;;  %p19_p7 = scmp.ge.s32.totalorder %s517_s24, 4   ;;  %s675_s19 = smov %s450_s20 }
 0x17d   : > { %s676_s20 = smov %s454_s21  ;;  %s677_s21 = smov %s529_s27 }
 0x17e   : > { %s678_s22 = smov %s517_s24  ;;  %21 = sbr.rel (!%p19_p7) target bundleno = 17 (0x11), region = 69 }
 0x185   :  { %225 = vsyncpa [#allocation5], 1 }
 0x186   :  { %227 = vsyncpa [#allocation5 + $0x1], 1 }
 0x187   :  { %228 = vsyncpa [#allocation6], 1 }
 0x188   :  { %230 = vsyncpa [#allocation6 + $0x1], 1 }

</bundles_post_ra>
